<compile_context>
chip_gen: v7x
topology: tpu7x:2x2x1
jax: 0.10.0
libtpu: 0.0.40
codegen_flags: <defaults>
</compile_context>

<pallas_src>
import functools

import jax
import jax.numpy as jnp
from jax.experimental import pallas as pl
from jax.experimental.pallas import tpu as pltpu


def _layernorm_kernel(x_ref, w_ref, b_ref, o_ref, *, eps, inv_hidden):
    # x_ref: (tile_rows, hidden)   w_ref / b_ref: (1, hidden)
    x = x_ref[...].astype(jnp.float32)
    mu = jnp.sum(x, axis=-1, keepdims=True) * inv_hidden
    xc = x - mu
    var = jnp.sum(xc * xc, axis=-1, keepdims=True) * inv_hidden
    rsigma = jax.lax.rsqrt(var + eps)

    gamma = w_ref[...]
    beta = b_ref[...]
    if gamma.dtype != jnp.float32:          # trace-time check; no per-iter cost for f32 params
        gamma = gamma.astype(jnp.float32)
        beta = beta.astype(jnp.float32)

    o_ref[...] = (xc * rsigma * gamma + beta).astype(o_ref.dtype)


def _chip_info():
    """Returns (vmem_capacity_bytes, is_v7, is_v5)."""
    kind = ""
    try:
        kind = jax.devices()[0].device_kind.lower()
    except Exception:  # pragma: no cover
        pass
    is_v7 = ("v7" in kind) or ("7x" in kind)
    is_v5 = "v5" in kind
    try:
        vmem_cap = int(pltpu.get_tpu_info().vmem_capacity_bytes)
    except Exception:  # pragma: no cover - fallback if the query is unavailable
        vmem_cap = (64 if is_v7 else 128) * 1024 * 1024
    return vmem_cap, is_v7, is_v5


def _pick_tile_rows(rows, hidden, x_dtype):
    """Dtype- and generation-aware row-tile sizing (LayerNorm is purely memory-bound)."""
    itemsize = jnp.dtype(x_dtype).itemsize
    # Sublane-packing minimum: 8 rows for 4-byte, 16 for 2-byte, 32 for 1-byte dtypes.
    min_rows = {4: 8, 2: 16, 1: 32}.get(itemsize, 8)

    vmem_cap, is_v7, is_v5 = _chip_info()

    # Per-row VMEM cost: double-buffered input + output blocks (native dtype) plus
    # roughly one hidden-wide f32 temporary (the rest of the math lives in vregs).
    bytes_per_row = hidden * (2 * 2 * itemsize + 4)
    budget = int(vmem_cap * 0.5)          # headroom for params / compiler scratch
    tile_from_budget = budget // max(bytes_per_row, 1)

    # Bytes-per-block target for the *input* block (amortizes ~0.35us/step overhead):
    #   v5e: modest blocks (HBM-bound anyway, keep store pressure low)
    #   v6e: 128 MiB VMEM -> grow to ~16 MiB
    #   v7x: 64 MiB VMEM, fastest HBM -> ~8 MiB keeps overhead fraction small and fits
    if is_v7:
        target_block_bytes = 8 * 1024 * 1024
    elif is_v5:
        target_block_bytes = 4 * 1024 * 1024
    else:
        target_block_bytes = 16 * 1024 * 1024
    tile_from_target = target_block_bytes // max(hidden * itemsize, 1)

    tile = min(tile_from_budget, tile_from_target)
    tile = max(min_rows, (tile // min_rows) * min_rows)
    # No point in a tile larger than the (min_rows-rounded) total row count.
    tile = min(tile, pl.cdiv(rows, min_rows) * min_rows)

    fits = (min_rows * bytes_per_row) <= int(vmem_cap * 0.9)
    return tile, vmem_cap, bytes_per_row, is_v7, fits


def _layernorm_ref(x, weight, bias, eps):
    """Plain-JAX fallback (used only when a minimum tile cannot fit VMEM)."""
    xf = x.astype(jnp.float32)
    mu = jnp.mean(xf, axis=-1, keepdims=True)
    var = jnp.mean((xf - mu) ** 2, axis=-1, keepdims=True)
    y = (xf - mu) * jax.lax.rsqrt(var + eps)
    return (y * weight.astype(jnp.float32) + bias.astype(jnp.float32)).astype(x.dtype)


def layernorm(x, weight, bias, eps=1e-5, *, tile_rows=None):
    """Functional equivalent of _LayerNorm.forward (TE LayerNorm fwd)."""
    hidden = weight.shape[-1]
    assert x.shape[-1] == hidden, "LayerNorm not possible"
    orig_shape = x.shape
    xmat = x.reshape(-1, hidden)          # XLA view-style reshape, no extra HBM pass
    rows = xmat.shape[0]
    itemsize = jnp.dtype(x.dtype).itemsize

    auto_tile, vmem_cap, bytes_per_row, is_v7, fits = _pick_tile_rows(rows, hidden, x.dtype)
    if not fits:
        # TODO(synk): add a split-hidden two-pass Pallas path for extremely wide hidden.
        return _layernorm_ref(x, weight, bias, eps)
    if tile_rows is None:
        tile_rows = auto_tile

    w2 = weight.reshape(1, hidden)
    b2 = bias.reshape(1, hidden)

    # Raise the scoped VMEM limit to fit the chosen tile, but stay under physical VMEM.
    need = tile_rows * bytes_per_row + 4 * hidden * 4
    vmem_limit = int(min(0.9 * vmem_cap, max(1.25 * need, 32 * 1024 * 1024)))

    # Only CORE_PARALLEL actually splits the row loop across v7x's 2 TensorCores;
    # on v5e/v6e (single TC) plain "parallel" is kept.
    row_sem = getattr(pltpu, "CORE_PARALLEL", "parallel") if is_v7 else "parallel"

    param_itemsize = jnp.dtype(weight.dtype).itemsize
    cost = pl.CostEstimate(
        flops=8 * rows * hidden,
        transcendentals=rows,                                    # one rsqrt per row
        bytes_accessed=2 * rows * hidden * itemsize + 2 * hidden * param_itemsize,
    )

    grid = (pl.cdiv(rows, tile_rows),)    # partial tail block is row-independent → safe
    out = pl.pallas_call(
        functools.partial(_layernorm_kernel, eps=eps, inv_hidden=1.0 / hidden),
        out_shape=jax.ShapeDtypeStruct((rows, hidden), x.dtype),
        grid_spec=pl.GridSpec(
            grid=grid,
            in_specs=[
                pl.BlockSpec((tile_rows, hidden), lambda i: (i, 0)),
                pl.BlockSpec((1, hidden), lambda i: (0, 0)),   # gamma: resident across grid
                pl.BlockSpec((1, hidden), lambda i: (0, 0)),   # beta:  resident across grid
            ],
            out_specs=pl.BlockSpec((tile_rows, hidden), lambda i: (i, 0)),
        ),
        compiler_params=pltpu.CompilerParams(
            dimension_semantics=(row_sem,),
            vmem_limit_bytes=vmem_limit,
        ),
        cost_estimate=cost,
    )(xmat, w2, b2)

    return out.reshape(orig_shape)


class LayerNorm:
    """Minimal JAX mirror of transformer_engine.pytorch.LayerNorm (forward only)."""
    # TODO(synk): backward (tex.layernorm_bwd) and sequence_parallel attrs not implemented.

    def __init__(self, hidden_size, eps=1e-5, params_dtype=jnp.float32):
        self.eps = eps
        # reset_layer_norm_parameters(): weight = ones, bias = zeros
        self.weight = jnp.ones((hidden_size,), dtype=params_dtype)
        self.bias = jnp.zeros((hidden_size,), dtype=params_dtype)

    def __call__(self, inp):
        return layernorm(inp, self.weight, self.bias, self.eps)


if __name__ == "__main__":
    batch, seq, hidden = 2, 8, 32
    key = jax.random.PRNGKey(0)
    x = jax.random.normal(key, (batch, seq, hidden), dtype=jnp.float32)

    ln = LayerNorm(hidden_size=hidden, eps=1e-5)
    y = ln(x)
    y = jax.block_until_ready(y)

    # Reference check against plain-JAX layernorm.
    mu = jnp.mean(x, axis=-1, keepdims=True)
    var = jnp.mean((x - mu) ** 2, axis=-1, keepdims=True)
    ref = (x - mu) / jnp.sqrt(var + 1e-5) * ln.weight + ln.bias
    assert y.shape == x.shape and y.dtype == x.dtype
    assert jnp.max(jnp.abs(y - ref)) < 1e-5

    print("KERNEL_OK")
</pallas_src>

<mosaic_0001>
module attributes {stable_mosaic.version = 11 : i64} {
  func.func @_layernorm_kernel(%arg0: i32, %arg1: memref<16x32xf32, #tpu.memory_space<vmem>>, %arg2: memref<1x32xf32, #tpu.memory_space<vmem>>, %arg3: memref<1x32xf32, #tpu.memory_space<vmem>>, %arg4: memref<16x32xf32, #tpu.memory_space<vmem>>) attributes {dimension_semantics = [#tpu.dimension_semantics<parallel>], iteration_bounds = array<i64: 1>, scalar_prefetch = 0 : i64, scratch_operands = 0 : i64, tpu.core_type = #tpu.core_type<tc>, window_params = [{transform_indices = @transform_0, window_bounds = array<i64: 16, 32>}, {pipeline_mode = #tpu.pipeline_mode<synchronous>, transform_indices = @transform_1, window_bounds = array<i64: 1, 32>}, {pipeline_mode = #tpu.pipeline_mode<synchronous>, transform_indices = @transform_2, window_bounds = array<i64: 1, 32>}, {transform_indices = @transform_3, window_bounds = array<i64: 16, 32>}]} {
    %c0 = arith.constant 0 : index
    %c0_0 = arith.constant 0 : index
    %0 = vector.load %arg1[%c0, %c0_0] : memref<16x32xf32, #tpu.memory_space<vmem>>, vector<16x32xf32>
    %cst = arith.constant dense<0.000000e+00> : vector<16xf32>
    %1 = vector.multi_reduction <add>, %0, %cst [1] : vector<16x32xf32> to vector<16xf32>
    %2 = vector.shape_cast %1 : vector<16xf32> to vector<16x1xf32>
    %cst_1 = arith.constant 3.125000e-02 : f32
    %3 = vector.broadcast %cst_1 : f32 to vector<16x1xf32>
    %4 = arith.mulf %2, %3 : vector<16x1xf32>
    %5 = vector.broadcast %4 : vector<16x1xf32> to vector<16x32xf32>
    %6 = arith.subf %0, %5 : vector<16x32xf32>
    %7 = arith.mulf %6, %6 : vector<16x32xf32>
    %cst_2 = arith.constant dense<0.000000e+00> : vector<16xf32>
    %8 = vector.multi_reduction <add>, %7, %cst_2 [1] : vector<16x32xf32> to vector<16xf32>
    %9 = vector.shape_cast %8 : vector<16xf32> to vector<16x1xf32>
    %cst_3 = arith.constant 3.125000e-02 : f32
    %10 = vector.broadcast %cst_3 : f32 to vector<16x1xf32>
    %11 = arith.mulf %9, %10 : vector<16x1xf32>
    %cst_4 = arith.constant 9.99999974E-6 : f32
    %12 = vector.broadcast %cst_4 : f32 to vector<16x1xf32>
    %13 = arith.addf %11, %12 : vector<16x1xf32>
    %14 = math.rsqrt %13 : vector<16x1xf32>
    %c0_5 = arith.constant 0 : index
    %c0_6 = arith.constant 0 : index
    %15 = vector.load %arg2[%c0_5, %c0_6] : memref<1x32xf32, #tpu.memory_space<vmem>>, vector<1x32xf32>
    %c0_7 = arith.constant 0 : index
    %c0_8 = arith.constant 0 : index
    %16 = vector.load %arg3[%c0_7, %c0_8] : memref<1x32xf32, #tpu.memory_space<vmem>>, vector<1x32xf32>
    %17 = vector.broadcast %14 : vector<16x1xf32> to vector<16x32xf32>
    %18 = arith.mulf %6, %17 : vector<16x32xf32>
    %19 = vector.broadcast %15 : vector<1x32xf32> to vector<16x32xf32>
    %20 = arith.mulf %18, %19 : vector<16x32xf32>
    %21 = vector.broadcast %16 : vector<1x32xf32> to vector<16x32xf32>
    %22 = arith.addf %20, %21 : vector<16x32xf32>
    %c0_9 = arith.constant 0 : index
    %c0_10 = arith.constant 0 : index
    %23 = vector.load %arg4[%c0_9, %c0_10] : memref<16x32xf32, #tpu.memory_space<vmem>>, vector<16x32xf32>
    tpu.vector_store %arg4[%c0_9, %c0_10], %22 {strides = array<i32>} : memref<16x32xf32, #tpu.memory_space<vmem>>, vector<16x32xf32>,
    return
  }
  func.func @transform_0(%arg0: i32) -> (i32, i32) {
    %c0_i32 = arith.constant 0 : i32
    %c0_i32_0 = arith.constant 0 : i32
    return %arg0, %c0_i32 : i32, i32
  }
  func.func @transform_1(%arg0: i32) -> (i32, i32) {
    %c0_i32 = arith.constant 0 : i32
    %c0_i32_0 = arith.constant 0 : i32
    %c0_i32_1 = arith.constant 0 : i32
    return %c0_i32, %c0_i32_0 : i32, i32
  }
  func.func @transform_2(%arg0: i32) -> (i32, i32) {
    %c0_i32 = arith.constant 0 : i32
    %c0_i32_0 = arith.constant 0 : i32
    %c0_i32_1 = arith.constant 0 : i32
    return %c0_i32, %c0_i32_0 : i32, i32
  }
  func.func @transform_3(%arg0: i32) -> (i32, i32) {
    %c0_i32 = arith.constant 0 : i32
    %c0_i32_0 = arith.constant 0 : i32
    return %arg0, %c0_i32 : i32, i32
  }
}

</mosaic_0001>

<bundles_post_ra>
// kernel: tpu_custom_call.1
= control target key start
LH: loop header
LB: loop body
LE: loop exit
PB: predicated region body
PF: predicated region fallthrough
CT: control target
= control target key end

     0   :  { %8 = vsyncpa [#allocation3], 0  ;;  %s219_s0 = inlined_call_operand.hbm [shape: f32[16,32], index: 0, kind: input, shape index: {}]   ;;  %s220_s1 = inlined_call_operand.vmem [shape: f32[1,32], index: 1, kind: input, shape index: {}]   ;;  %s221_s2 = inlined_call_operand.vmem [shape: f32[1,32], index: 2, kind: input, shape index: {}]   ;;  %s222_s3 = inlined_call_operand.hbm [shape: f32[16,32], index: 3, kind: output, shape index: {}]  }
   0x1   :  { %9 = vsyncpa [#allocation4], 0  ;;  %s153_s12 = smov [#allocation2]   ;;  %s105_s16 = scalar_lea.hbm %s219_s0, 256 }
   0x2   :  { %s15_s13 = sshll.u32 %s153_s12, 4  ;;  %p106_p0 = scmp.ne.s32.totalorder %s219_s0, %s105_s16  ;;  %s16_s13 = int_to_ptr.vmem [resolvable:$true] %s15_s13 }
   0x3   :  { %p109_p1 = scmp.lt.u32.totalorder %s105_s16, %s219_s0 }
   0x5   :  { %p111_p2 = pnand %p109_p1, %p106_p0 }
   0x7   :  { %114 = shalt.err (!%p111_p2)
}
   0x8   :  { %s115_s21 = scalar_lea.vmem %s16_s13, 256  ;;  %p120_p4 = scmp.lt.s32.totalorder %s16_s13, %s16_s13 }
   0x9   :  { %p116_p3 = scmp.ne.s32.totalorder %s16_s13, %s115_s21  ;;  %p121_p5 = scmp.lt.s32.totalorder %s115_s21, %s115_s21 }
   0xb   :  { %p122_p6 = por %p121_p5, %p120_p4 }
   0xd   :  { %p123_p7 = pnand %p122_p6, %p116_p3 }
   0xf   :  { %126 = shalt.err (!%p123_p7)
}
  0x10   :  { %s154_s22 = smov 128   ;;  %s155_s23 = smov 8  }
  0x11   :  { %21 = dma.hbm_to_vmem [thread:$0]  %s219_s0, 256, %s16_s13, [#allocation3], %s154_s22, %s154_s22, %s155_s23  }
  0x12   :  { %149 = dma.done.wait [#allocation3], 256  }
  0x13   :  { %150 = vsyncadd [#allocation3], 4294967040  ;;  %vm31_vm0 = vcmask 261120   ;;  %v29_v0 = vld [vmem:[#allocation2] sm:$0xff]  ;;  %v30_v1 = vld [vmem:[#allocation2 + $0x8] sm:$0xff]  ;;  %s156_s29 = smov [#allocation5]  }
  0x14   :  { %v32_v2 = vsel %vm31_vm0, %v29_v0, 0.0  ;;  %v35_v3 = vsel %vm31_vm0, %v30_v1, 0.0  ;;  %v95_v21 = vld [vmem:[%s220_s1] ss:$0 sm:$0xff]  ;;  %s83_s30 = sshll.u32 %s156_s29, 4  ;;  %s84_s30 = int_to_ptr.vmem [resolvable:$true] %s83_s30 }
  0x15   :  { %33 = vadd.xlane.f32.xlu0 %v32_v2  ;;  %v96_v23 = vld [vmem:[%s221_s2] ss:$0 sm:$0xff]  ;;  %s127_s4 = scalar_lea.vmem %s84_s30, 256  ;;  %p132_p9 = scmp.lt.s32.totalorder %s84_s30, %s84_s30 }
  0x16   :  { %p128_p8 = scmp.ne.s32.totalorder %s84_s30, %s127_s4  ;;  %p133_p10 = scmp.lt.s32.totalorder %s127_s4, %s127_s4 }
  0x18   :  { %p134_p11 = por %p133_p10, %p132_p9 }
  0x19   :  { %36 = vadd.xlane.f32.xlu0 %v35_v3 }
  0x1a   :  { %p135_p12 = pnand %p134_p11, %p128_p8 }
  0xa2   :  { %v34_v4 = vpop.xlane.xlu0 %33 }
  0xa3   :  { %v38_v5 = vmul.f32 0.03125, %v34_v4 }
  0xa5   :  { %v40_v6 = vsub.f32 %v29_v0, %v38_v5 }
  0xa6   :  { %v37_v7 = vpop.xlane.xlu0 %36 }
  0xa7   :  { %v39_v8 = vmul.f32 0.03125, %v37_v7  ;;  %v42_v9 = vmul.f32 %v40_v6, %v40_v6 }
  0xa9   :  { %v41_v10 = vsub.f32 %v30_v1, %v39_v8  ;;  %v44_v11 = vsel %vm31_vm0, %v42_v9, 0.0 }
  0xaa   :  { %45 = vadd.xlane.f32.xlu1 %v44_v11 }
  0xab   :  { %v43_v12 = vmul.f32 %v41_v10, %v41_v10 }
  0xad   :  { %v47_v13 = vsel %vm31_vm0, %v43_v12, 0.0 }
  0xae   :  { %48 = vadd.xlane.f32.xlu1 %v47_v13 }
 0x137   :  { %v46_v14 = vpop.xlane.xlu1 %45 }
 0x138   :  { %v50_v15 = vmul.f32 0.03125, %v46_v14 }
 0x13a   :  { %v52_v16 = vadd.f32 1e-05, %v50_v15 }
 0x13b   :  { %v49_v17 = vpop.xlane.xlu1 %48 }
 0x13c   :  { %101 = vrsqrt.f32 %v52_v16  ;;  %v51_v18 = vmul.f32 0.03125, %v49_v17 }
 0x13e   :  { %v53_v19 = vadd.f32 1e-05, %v51_v18 }
 0x140   :  { %103 = vrsqrt.f32 %v53_v19 }
 0x146   :  { %v102_v20 = vpop.eup %101 }
 0x147   :  { %v58_v22 = vmul.f32 %v102_v20, %v40_v6 }
 0x149   :  { %v66_v24 = vmul.f32 %v95_v21, %v58_v22 }
 0x14a   :  { %v104_v25 = vpop.eup %103 }
 0x14b   :  { %v59_v26 = vmul.f32 %v104_v25, %v41_v10  ;;  %v74_v27 = vadd.f32 %v96_v23, %v66_v24 }
 0x14d   :  { %v67_v28 = vmul.f32 %v95_v21, %v59_v26  ;;  %76 = vst.msk [vmem:[#allocation5] sm:$0xff] %vm31_vm0, %v74_v27 }
 0x14f   :  { %v75_v29 = vadd.f32 %v96_v23, %v67_v28 }
 0x151   :  { %77 = vst.msk [vmem:[#allocation5 + $0x8] sm:$0xff] %vm31_vm0, %v75_v29 }
 0x152   :  { %138 = shalt.err (!%p135_p12)
}
 0x153   :  { %s139_s5 = scalar_lea.hbm %s222_s3, 256 }
 0x154   :  { %p140_p13 = scmp.ne.s32.totalorder %s222_s3, %s139_s5  ;;  %p143_p0 = scmp.lt.u32.totalorder %s139_s5, %s222_s3 }
 0x156   :  { %p145_p1 = pnand %p143_p0, %p140_p13 }
 0x158   :  { %148 = shalt.err (!%p145_p1)
}
 0x159   :  { %89 = dma.vmem_to_hbm [thread:$0]  %s84_s30, 256, %s222_s3, [#allocation4], %s154_s22, %s154_s22, %s155_s23  }
 0x15a   :  { %151 = dma.done.wait [#allocation4], 256  }
 0x15b   :  { %152 = vsyncadd [#allocation4], 4294967040 }
 0x15c   :  { %93 = vsyncpa [#allocation3], 1 }
 0x15d   :  { %94 = vsyncpa [#allocation4], 1 }

</bundles_post_ra>
